<compile_context>
chip_gen: v5e
topology: v5e:2x2
jax: 0.10.0
libtpu: 0.0.40
codegen_flags: <defaults>
</compile_context>

<pallas_src>
import functools
import math

import jax
import jax.numpy as jnp
from jax.experimental import pallas as pl
from jax.experimental.pallas import tpu as pltpu


def _round_up(x: int, m: int) -> int:
    return ((x + m - 1) // m) * m


def _mlp_fused_kernel(x_ref, *refs, num_layers: int):
    """Fused (Linear -> ReLU)*(L-1) -> Linear on one lane-dense batch tile.

    x_ref : (tb, dp0)          f32 padded activations
    refs  : w0, b0, w1, b1, ..., o_ref
      w_l : (dp_l, dp_{l+1})   bf16 padded weight (in, out)
      b_l : (1, dp_{l+1})      f32 padded bias
    o_ref : (tb, dp_L)         f32 padded output slab (lane-dense store)
    """
    o_ref = refs[-1]
    h = x_ref[...]
    # Static unroll: at typical MLP depths this is cheapest and lets each dot
    # use its own padded (K, N).  A fori_loop + VMEM scratch version would only
    # pay off for very deep stacks / very large tiles.
    for l in range(num_layers):
        w = refs[2 * l][...]        # bf16
        b = refs[2 * l + 1][...]    # f32, (1, dp_out) broadcasts over rows
        h = jnp.dot(h.astype(jnp.bfloat16), w,
                    preferred_element_type=jnp.float32)
        h = h + b
        if l < num_layers - 1:
            h = jnp.maximum(h, 0.0)
    o_ref[...] = h.astype(o_ref.dtype)


def pack_mlp_params(params):
    """Pad/cast params ONCE (hoisted out of the per-forward-call path).

    Returns (weights, biases, dims):
      weights[l]: bf16 (round_up(in,128), round_up(out,128)), zero padded
      biases[l] : f32  (1, round_up(out,128)), zero padded
      dims      : logical (d_in, d_h1, ..., d_out)
    Zero padding is exact: padded weight rows/cols and bias lanes are zero, so
    padded activation lanes stay exactly zero through every Linear+ReLU.
    """
    weights, biases = [], []
    dims = [params[0][0].shape[0]]
    for w, b in params:
        din, dout = w.shape
        dims.append(dout)
        dpi, dpo = _round_up(din, 128), _round_up(dout, 128)
        wp = jnp.zeros((dpi, dpo), jnp.bfloat16).at[:din, :dout].set(
            w.astype(jnp.bfloat16))
        bp = jnp.zeros((1, dpo), jnp.float32).at[0, :dout].set(
            b.astype(jnp.float32))
        weights.append(wp)
        biases.append(bp)
    return tuple(weights), tuple(biases), tuple(dims)


@functools.partial(jax.jit, static_argnums=(3,))
def _mlp_forward_padded(weights, biases, x, d_out):
    num_layers = len(weights)
    B, d_in = x.shape
    dp0 = weights[0].shape[0]
    dp_last = weights[-1].shape[1]

    # MXU-aware batch tile: fill the 256x256 (v6e/v7x) / 128x128 (v5e) array
    # for large B and keep >=2 grid steps so both v7x TensorCores get work
    # (dimension_semantics=("parallel",)); tiny batches stay a single tile.
    if B >= 512:
        tb = 256
    elif B >= 256:
        tb = 128
    elif B >= 128:
        tb = 64
    else:
        tb = max(8, _round_up(B, 8))
    b_pad = _round_up(B, tb)

    # Per-call padding of the activations only (params were packed once).
    x_pad = jnp.zeros((b_pad, dp0), jnp.float32).at[:B, :d_in].set(x)

    # VMEM budget (v7x has only 64 MiB physical): weights/biases single-
    # buffered (grid-invariant), activation tiles double-buffered by the
    # BlockSpec pipeline, plus the live f32 intermediate.
    w_bytes = sum(math.prod(w.shape) * 2 for w in weights)       # bf16
    b_bytes = sum(math.prod(b.shape) * 4 for b in biases)        # f32
    max_dp = max(w.shape[1] for w in weights)
    act_bytes = (2 * tb * dp0 + 2 * tb * dp_last + 2 * tb * max_dp) * 4
    vmem_needed = w_bytes + b_bytes + act_bytes
    vmem_limit = int(min(64 << 20, max(2 * vmem_needed, 16 << 20)))
    # TODO(synk): if any single padded weight exceeds ~1/4 of VMEM (e.g. 4096^2
    # layers), add a K/N-tiled grid axis (or pltpu.emit_pipeline over weight
    # tiles) instead of keeping the whole weight stack resident.

    in_specs = [pl.BlockSpec((tb, dp0), lambda i: (i, 0))]
    operands = [x_pad]
    for w, b in zip(weights, biases):
        # Grid-invariant index_map -> single-buffered: no 2x weight slab.
        in_specs.append(pl.BlockSpec(w.shape, lambda i: (0, 0),
                                     pipeline_mode=pl.Buffered(1)))
        in_specs.append(pl.BlockSpec(b.shape, lambda i: (0, 0),
                                     pipeline_mode=pl.Buffered(1)))
        operands.append(w)
        operands.append(b)

    kernel = functools.partial(_mlp_fused_kernel, num_layers=num_layers)
    out_pad = pl.pallas_call(
        kernel,
        out_shape=jax.ShapeDtypeStruct((b_pad, dp_last), jnp.float32),
        grid=(b_pad // tb,),
        in_specs=in_specs,
        out_specs=pl.BlockSpec((tb, dp_last), lambda i: (i, 0)),
        compiler_params=pltpu.CompilerParams(
            dimension_semantics=("parallel",),   # batch tiles are independent
            vmem_limit_bytes=vmem_limit,
        ),
    )(*operands)

    # Slice the lane-dense slab back to the logical (B, Dout) result.
    return out_pad[:B, :d_out]


def mlp_forward(packed, x):
    weights, biases, dims = packed
    return _mlp_forward_padded(weights, biases, x, dims[-1])


def init_mlp_params(key, input_size, hidden_sizes, output_size):
    """Deterministic init matching PyTorch nn.Linear shapes (W already (in,out))."""
    sizes = [input_size] + list(hidden_sizes) + [output_size]
    params = []
    for i in range(len(sizes) - 1):
        fan_in, fan_out = sizes[i], sizes[i + 1]
        key, kw, kb = jax.random.split(key, 3)
        bound = 1.0 / jnp.sqrt(float(fan_in))
        w = jax.random.uniform(kw, (fan_in, fan_out), jnp.float32, -bound, bound)
        b = jax.random.uniform(kb, (fan_out,), jnp.float32, -bound, bound)
        params.append((w, b))
    return params


def mse_loss(y_pred, y_true):
    # Mirrors nn.MSELoss() (mean reduction); plain JAX glue, not hot path.
    return jnp.mean((y_pred - y_true) ** 2)


if __name__ == "__main__":
    key = jax.random.PRNGKey(0)
    input_size = 32
    hidden_sizes = [64, 64]
    output_size = 16
    batch = 8

    kx, ky, kp = jax.random.split(key, 3)
    x = jax.random.normal(kx, (batch, input_size), jnp.float32)
    y_true = jax.random.normal(ky, (batch, output_size), jnp.float32)

    params = init_mlp_params(kp, input_size, hidden_sizes, output_size)
    packed = pack_mlp_params(params)      # one-time pad/cast, NOT per call

    y_pred = jax.block_until_ready(mlp_forward(packed, x))

    # Reference check against plain-JAX f32 forward (module semantics).
    h = x
    for i, (w, b) in enumerate(params):
        h = h @ w + b
        if i < len(params) - 1:
            h = jnp.maximum(h, 0.0)
    assert y_pred.shape == (batch, output_size)
    # bf16 MXU operands with f32 accumulation: tolerance relaxed vs pure-f32.
    err = float(jnp.max(jnp.abs(y_pred - h)))
    assert jnp.allclose(y_pred, h, atol=5e-2, rtol=5e-2), err

    loss = jax.block_until_ready(mse_loss(y_pred, y_true))
    assert loss.shape == ()

    print("KERNEL_OK")
</pallas_src>

<mosaic_0001>
module attributes {stable_mosaic.version = 11 : i64} {
  func.func @_mlp_fused_kernel(%arg0: i32, %arg1: memref<8x128xf32, #tpu.memory_space<vmem>>, %arg2: memref<128x128xbf16, #tpu.memory_space<vmem>>, %arg3: memref<1x128xf32, #tpu.memory_space<vmem>>, %arg4: memref<128x128xbf16, #tpu.memory_space<vmem>>, %arg5: memref<1x128xf32, #tpu.memory_space<vmem>>, %arg6: memref<128x128xbf16, #tpu.memory_space<vmem>>, %arg7: memref<1x128xf32, #tpu.memory_space<vmem>>, %arg8: memref<8x128xf32, #tpu.memory_space<vmem>>) attributes {dimension_semantics = [#tpu.dimension_semantics<parallel>], iteration_bounds = array<i64: 1>, scalar_prefetch = 0 : i64, scratch_operands = 0 : i64, tpu.core_type = #tpu.core_type<tc>, window_params = [{transform_indices = @transform_0, window_bounds = array<i64: 8, 128>}, {pipeline_mode = #tpu.pipeline_mode<synchronous>, transform_indices = @transform_1, window_bounds = array<i64: 128, 128>}, {pipeline_mode = #tpu.pipeline_mode<synchronous>, transform_indices = @transform_2, window_bounds = array<i64: 1, 128>}, {pipeline_mode = #tpu.pipeline_mode<synchronous>, transform_indices = @transform_3, window_bounds = array<i64: 128, 128>}, {pipeline_mode = #tpu.pipeline_mode<synchronous>, transform_indices = @transform_4, window_bounds = array<i64: 1, 128>}, {pipeline_mode = #tpu.pipeline_mode<synchronous>, transform_indices = @transform_5, window_bounds = array<i64: 128, 128>}, {pipeline_mode = #tpu.pipeline_mode<synchronous>, transform_indices = @transform_6, window_bounds = array<i64: 1, 128>}, {transform_indices = @transform_7, window_bounds = array<i64: 8, 128>}]} {
    %c0 = arith.constant 0 : index
    %c0_0 = arith.constant 0 : index
    %0 = vector.load %arg1[%c0, %c0_0] : memref<8x128xf32, #tpu.memory_space<vmem>>, vector<8x128xf32>
    %c0_1 = arith.constant 0 : index
    %c0_2 = arith.constant 0 : index
    %1 = vector.load %arg2[%c0_1, %c0_2] : memref<128x128xbf16, #tpu.memory_space<vmem>>, vector<128x128xbf16>
    %c0_3 = arith.constant 0 : index
    %c0_4 = arith.constant 0 : index
    %2 = vector.load %arg3[%c0_3, %c0_4] : memref<1x128xf32, #tpu.memory_space<vmem>>, vector<1x128xf32>
    %3 = arith.truncf %0 : vector<8x128xf32> to vector<8x128xbf16>
    %cst = arith.constant dense<0.000000e+00> : vector<8x128xf32>
    %4 = tpu.matmul %3, %1, %cst {dimension_numbers = #tpu.dot_dimension_numbers<[1], [0], [0], [1], [0, 0, 1, 1], [], []>} : vector<8x128xbf16>, vector<128x128xbf16>, vector<8x128xf32> -> vector<8x128xf32>
    %5 = vector.broadcast %2 : vector<1x128xf32> to vector<8x128xf32>
    %6 = arith.addf %4, %5 : vector<8x128xf32>
    %cst_5 = arith.constant 0.000000e+00 : f32
    %7 = vector.broadcast %cst_5 : f32 to vector<8x128xf32>
    %8 = arith.maximumf %6, %7 : vector<8x128xf32>
    %c0_6 = arith.constant 0 : index
    %c0_7 = arith.constant 0 : index
    %9 = vector.load %arg4[%c0_6, %c0_7] : memref<128x128xbf16, #tpu.memory_space<vmem>>, vector<128x128xbf16>
    %c0_8 = arith.constant 0 : index
    %c0_9 = arith.constant 0 : index
    %10 = vector.load %arg5[%c0_8, %c0_9] : memref<1x128xf32, #tpu.memory_space<vmem>>, vector<1x128xf32>
    %11 = arith.truncf %8 : vector<8x128xf32> to vector<8x128xbf16>
    %cst_10 = arith.constant dense<0.000000e+00> : vector<8x128xf32>
    %12 = tpu.matmul %11, %9, %cst_10 {dimension_numbers = #tpu.dot_dimension_numbers<[1], [0], [0], [1], [0, 0, 1, 1], [], []>} : vector<8x128xbf16>, vector<128x128xbf16>, vector<8x128xf32> -> vector<8x128xf32>
    %13 = vector.broadcast %10 : vector<1x128xf32> to vector<8x128xf32>
    %14 = arith.addf %12, %13 : vector<8x128xf32>
    %cst_11 = arith.constant 0.000000e+00 : f32
    %15 = vector.broadcast %cst_11 : f32 to vector<8x128xf32>
    %16 = arith.maximumf %14, %15 : vector<8x128xf32>
    %c0_12 = arith.constant 0 : index
    %c0_13 = arith.constant 0 : index
    %17 = vector.load %arg6[%c0_12, %c0_13] : memref<128x128xbf16, #tpu.memory_space<vmem>>, vector<128x128xbf16>
    %c0_14 = arith.constant 0 : index
    %c0_15 = arith.constant 0 : index
    %18 = vector.load %arg7[%c0_14, %c0_15] : memref<1x128xf32, #tpu.memory_space<vmem>>, vector<1x128xf32>
    %19 = arith.truncf %16 : vector<8x128xf32> to vector<8x128xbf16>
    %cst_16 = arith.constant dense<0.000000e+00> : vector<8x128xf32>
    %20 = tpu.matmul %19, %17, %cst_16 {dimension_numbers = #tpu.dot_dimension_numbers<[1], [0], [0], [1], [0, 0, 1, 1], [], []>} : vector<8x128xbf16>, vector<128x128xbf16>, vector<8x128xf32> -> vector<8x128xf32>
    %21 = vector.broadcast %18 : vector<1x128xf32> to vector<8x128xf32>
    %22 = arith.addf %20, %21 : vector<8x128xf32>
    %c0_17 = arith.constant 0 : index
    %c0_18 = arith.constant 0 : index
    %23 = vector.load %arg8[%c0_17, %c0_18] : memref<8x128xf32, #tpu.memory_space<vmem>>, vector<8x128xf32>
    tpu.vector_store %arg8[%c0_17, %c0_18], %22 {strides = array<i32>} : memref<8x128xf32, #tpu.memory_space<vmem>>, vector<8x128xf32>,
    return
  }
  func.func @transform_0(%arg0: i32) -> (i32, i32) {
    %c0_i32 = arith.constant 0 : i32
    %c0_i32_0 = arith.constant 0 : i32
    return %arg0, %c0_i32 : i32, i32
  }
  func.func @transform_1(%arg0: i32) -> (i32, i32) {
    %c0_i32 = arith.constant 0 : i32
    %c0_i32_0 = arith.constant 0 : i32
    %c0_i32_1 = arith.constant 0 : i32
    return %c0_i32, %c0_i32_0 : i32, i32
  }
  func.func @transform_2(%arg0: i32) -> (i32, i32) {
    %c0_i32 = arith.constant 0 : i32
    %c0_i32_0 = arith.constant 0 : i32
    %c0_i32_1 = arith.constant 0 : i32
    return %c0_i32, %c0_i32_0 : i32, i32
  }
  func.func @transform_3(%arg0: i32) -> (i32, i32) {
    %c0_i32 = arith.constant 0 : i32
    %c0_i32_0 = arith.constant 0 : i32
    %c0_i32_1 = arith.constant 0 : i32
    return %c0_i32, %c0_i32_0 : i32, i32
  }
  func.func @transform_4(%arg0: i32) -> (i32, i32) {
    %c0_i32 = arith.constant 0 : i32
    %c0_i32_0 = arith.constant 0 : i32
    %c0_i32_1 = arith.constant 0 : i32
    return %c0_i32, %c0_i32_0 : i32, i32
  }
  func.func @transform_5(%arg0: i32) -> (i32, i32) {
    %c0_i32 = arith.constant 0 : i32
    %c0_i32_0 = arith.constant 0 : i32
    %c0_i32_1 = arith.constant 0 : i32
    return %c0_i32, %c0_i32_0 : i32, i32
  }
  func.func @transform_6(%arg0: i32) -> (i32, i32) {
    %c0_i32 = arith.constant 0 : i32
    %c0_i32_0 = arith.constant 0 : i32
    %c0_i32_1 = arith.constant 0 : i32
    return %c0_i32, %c0_i32_0 : i32, i32
  }
  func.func @transform_7(%arg0: i32) -> (i32, i32) {
    %c0_i32 = arith.constant 0 : i32
    %c0_i32_0 = arith.constant 0 : i32
    return %arg0, %c0_i32 : i32, i32
  }
}

</mosaic_0001>

<bundles_post_ra>
// kernel: _mlp_forward_padded.1
= control target key start
LH: loop header
LB: loop body
LE: loop exit
PB: predicated region body
PF: predicated region fallthrough
CT: control target
= control target key end

     0   :  { %12 = vsyncpa [#allocation3], 0  ;;  %s643_s0 = inlined_call_operand.vmem [shape: f32[8,128], index: 0, kind: input, shape index: {}]   ;;  %s644_s1 = inlined_call_operand.hbm [shape: bf16[128,128], index: 1, kind: input, shape index: {}]   ;;  %s645_s2 = inlined_call_operand.vmem [shape: f32[1,128], index: 2, kind: input, shape index: {}]   ;;  %s646_s3 = inlined_call_operand.hbm [shape: bf16[128,128], index: 3, kind: input, shape index: {}]   ;;  %s647_s4 = inlined_call_operand.vmem [shape: f32[1,128], index: 4, kind: input, shape index: {}]   ;;  %s648_s5 = inlined_call_operand.hbm [shape: bf16[128,128], index: 5, kind: input, shape index: {}]   ;;  %s649_s6 = inlined_call_operand.vmem [shape: f32[1,128], index: 6, kind: input, shape index: {}]   ;;  %s650_s7 = inlined_call_operand.hbm [shape: f32[8,128], index: 7, kind: output, shape index: {}]  }
   0x1   :  { %13 = vsyncpa [#allocation6], 0 }
   0x2   :  { %14 = vsyncpa [#allocation4], 0  ;;  %s36_s26 = sshll.u32 %s646_s3, 4  ;;  %s573_s27 = smov [#allocation5]   ;;  %s37_s26 = int_to_ptr.hbm [resolvable:$true] %s36_s26 }
   0x3   :  { %s38_s28 = sshll.u32 %s573_s27, 4  ;;  %s21_s8 = sshll.u32 %s644_s1, 4  ;;  %s39_s28 = int_to_ptr.vmem [resolvable:$true] %s38_s28  ;;  %s22_s8 = int_to_ptr.hbm [resolvable:$true] %s21_s8 }
   0x4   :  { %s574_s9 = smov 64   ;;  %s575_s10 = smov 4  }
   0x5   :  { %44 = dma.hbm_to_vmem [thread:$0]  %s37_s26, 1024, %s39_s28, [#allocation6], %s574_s9, %s574_s9, %s575_s10  }
   0x6   :  { %s576_s11 = smov [#allocation2]   ;;  %s51_s15 = sshll.u32 %s648_s5, 4  ;;  %s52_s15 = int_to_ptr.hbm [resolvable:$true] %s51_s15 }
   0x7   :  { %s23_s12 = sshll.u32 %s576_s11, 4  ;;  %s577_s3 = smov [#allocation7]   ;;  %s24_s12 = int_to_ptr.vmem [resolvable:$true] %s23_s12 }
   0x8   :  { %29 = dma.hbm_to_vmem [thread:$0]  %s22_s8, 1024, %s24_s12, [#allocation3], %s574_s9, %s574_s9, %s575_s10  }
   0x9   :  { %s53_s16 = sshll.u32 %s577_s3, 4  ;;  %s54_s16 = int_to_ptr.vmem [resolvable:$true] %s53_s16 }
   0xa   :  { %59 = dma.hbm_to_vmem [thread:$0]  %s52_s15, 1024, %s54_s16, [#allocation6], %s574_s9, %s574_s9, %s575_s10  }
   0xb   :  { %567 = dma.done.wait [#allocation3], 1024  }
   0xc   :  { %568 = vsyncadd [#allocation3], 4294966272 }
   0xd   :  { %569 = dma.done.wait [#allocation6], 2048  }
   0xe   :  { %570 = vsyncadd [#allocation6], 4294965248  ;;  %v445_v0 = vld [vmem:[#allocation2 + $0x38] sm:$0xff]  ;;  %v444_v1 = vld [vmem:[#allocation2 + $0x30] sm:$0xff]  ;;  %s578_s21 = smov [#allocation8]   ;;  %s331_s25 = sshll.u32 %s650_s7, 4  ;;  %s332_s25 = int_to_ptr.hbm [resolvable:$true] %s331_s25 }
   0xf   :  { %144 = vmatpush.bf16.msra.mxu0 %v445_v0  ;;  %v453_v2 = vld [vmem:[#allocation5 + $0x38] sm:$0xff]  ;;  %v452_v3 = vld [vmem:[#allocation5 + $0x30] sm:$0xff]  ;;  %v443_v4 = vld [vmem:[#allocation2 + $0x28] sm:$0xff]  ;;  %s329_s22 = sshll.u32 %s578_s21, 4  ;;  %s330_s22 = int_to_ptr.vmem [resolvable:$true] %s329_s22 }
  0x10   :  { %227 = vmatpush.bf16.msra.mxu1 %v453_v2  ;;  %v451_v5 = vld [vmem:[#allocation5 + $0x28] sm:$0xff]  ;;  %v442_v6 = vld [vmem:[#allocation2 + $0x20] sm:$0xff]  ;;  %v441_v8 = vld [vmem:[#allocation2 + $0x18] sm:$0xff] }
  0x11   :  { %v450_v7 = vld [vmem:[#allocation5 + $0x20] sm:$0xff]  ;;  %v449_v9 = vld [vmem:[#allocation5 + $0x18] sm:$0xff]  ;;  %v440_v10 = vld [vmem:[#allocation2 + $0x10] sm:$0xff] }
  0x12   :  { %v448_v11 = vld [vmem:[#allocation5 + $0x10] sm:$0xff]  ;;  %v439_v12 = vld [vmem:[#allocation2 + $0x8] sm:$0xff]  ;;  %v438_v13 = vld [vmem:[#allocation2] sm:$0xff] }
  0x13   :  { %145 = vmatpush.bf16.msra.mxu0 %v444_v1  ;;  %v74_v14 = vld [vmem:[%s643_s0] sm:$0xff]  ;;  %v447_v16 = vld [vmem:[#allocation5 + $0x8] sm:$0xff]  ;;  %v461_v18 = vld [vmem:[#allocation7 + $0x38] sm:$0xff] }
  0x14   :  { %228 = vmatpush.bf16.msra.mxu1 %v452_v3  ;;  %v92_v15 = vpack.c.bf16 %v74_v14, %v74_v14  ;;  %v446_v17 = vld [vmem:[#allocation5] sm:$0xff]  ;;  %310 = vmatpush.bf16.msra.mxu2 %v461_v18  ;;  %v460_v19 = vld [vmem:[#allocation7 + $0x30] sm:$0xff]  ;;  %v459_v20 = vld [vmem:[#allocation7 + $0x28] sm:$0xff] }
  0x15   :  { %v458_v21 = vld [vmem:[#allocation7 + $0x20] sm:$0xff]  ;;  %v457_v22 = vld [vmem:[#allocation7 + $0x18] sm:$0xff]  ;;  %v456_v23 = vld [vmem:[#allocation7 + $0x10] sm:$0xff] }
  0x16   :  { %v468_v24 = vld [vmem:[%s645_s2] ss:$0 sm:$0xff]  ;;  %v455_v30 = vld [vmem:[#allocation7 + $0x8] sm:$0xff] }
  0x17   :  { %146 = vmatpush.bf16.msra.mxu0 %v443_v4  ;;  %v454_v31 = vld [vmem:[#allocation7] sm:$0xff] }
  0x18   :  { %229 = vmatpush.bf16.msra.mxu1 %v451_v5  ;;  %311 = vmatpush.bf16.msra.mxu2 %v460_v19  ;;  %v469_v32 = vld [vmem:[%s647_s4] ss:$0 sm:$0xff] }
  0x19   :  { %v470_v38 = vld [vmem:[%s649_s6] ss:$0 sm:$0xff] }
  0x1b   :  { %147 = vmatpush.bf16.msra.mxu0 %v442_v6 }
  0x1c   :  { %230 = vmatpush.bf16.msra.mxu1 %v450_v7  ;;  %312 = vmatpush.bf16.msra.mxu2 %v459_v20 }
  0x1f   :  { %148 = vmatpush.bf16.msra.mxu0 %v441_v8 }
  0x20   :  { %231 = vmatpush.bf16.msra.mxu1 %v449_v9  ;;  %313 = vmatpush.bf16.msra.mxu2 %v458_v21 }
  0x23   :  { %149 = vmatpush.bf16.msra.mxu0 %v440_v10 }
  0x24   :  { %232 = vmatpush.bf16.msra.mxu1 %v448_v11  ;;  %314 = vmatpush.bf16.msra.mxu2 %v457_v22 }
  0x27   :  { %150 = vmatpush.bf16.msra.mxu0 %v439_v12 }
  0x28   :  { %233 = vmatpush.bf16.msra.mxu1 %v447_v16  ;;  %315 = vmatpush.bf16.msra.mxu2 %v456_v23 }
  0x2b   :  { %151 = vmatpush.bf16.msra.mxu0 %v438_v13 }
  0x2c   :  { %234 = vmatpush.bf16.msra.mxu1 %v446_v17  ;;  %316 = vmatpush.bf16.msra.mxu2 %v455_v30 }
  0x2e   :  { %152 = vmatmul.bf16.vlgmr.msra.gmra.mxu0 %v92_v15 }
  0x30   :  { %317 = vmatpush.bf16.msra.mxu2 %v454_v31 }
  0xab   :  { %v153_v25 = vpop.f32.mrf.mxu0 }
  0xac   :  { %v154_v26 = vadd.f32 %v468_v24, %v153_v25 }
  0xae   :  { %v157_v27 = vmax.f32 %v154_v26, 0.0 }
  0xb0   :  { %v175_v28 = vpack.c.bf16 %v157_v27, %v157_v27 }
  0xb2   :  { %235 = vmatmul.bf16.vlgmr.msra.gmra.mxu1 %v175_v28 }
  0xb3   :  { %v155_v29 = vpop.f32.mrf.mxu0 }
 0x12f   :  { %v236_v33 = vpop.f32.mrf.mxu1 }
 0x130   :  { %v237_v34 = vadd.f32 %v469_v32, %v236_v33 }
 0x132   :  { %v240_v35 = vmax.f32 %v237_v34, 0.0 }
 0x134   :  { %v258_v36 = vpack.c.bf16 %v240_v35, %v240_v35 }
 0x136   :  { %318 = vmatmul.bf16.vlgmr.msra.gmra.mxu2 %v258_v36 }
 0x137   :  { %v238_v37 = vpop.f32.mrf.mxu1 }
 0x1b9   :  { %v319_v39 = vpop.f32.mrf.mxu2 }
 0x1ba   :  { %v320_v40 = vadd.f32 %v470_v38, %v319_v39 }
 0x1bc   :  { %323 = vst [vmem:[#allocation8] sm:$0xff] %v320_v40 }
 0x1bd   :  { %334 = dma.vmem_to_hbm [thread:$0]  %s330_s22, 128, %s332_s25, [#allocation4]  }
 0x1c1   :  { %v321_v41 = vpop.f32.mrf.mxu2 }
 0x1c2   :  { %571 = dma.done.wait [#allocation4], 128  }
 0x1c3   :  { %572 = vsyncadd [#allocation4], 4294967168 }
 0x1c4   :  { %339 = vsyncpa [#allocation3], 1 }
 0x1c5   :  { %340 = vsyncpa [#allocation6], 1 }
 0x1c6   :  { %341 = vsyncpa [#allocation4], 1 }

</bundles_post_ra>
